<compile_context>
chip_gen: v7x
topology: tpu7x:2x2x1
jax: 0.10.0
libtpu: 0.0.40
codegen_flags: <defaults>
</compile_context>

<pallas_src>
import jax
import jax.numpy as jnp
from jax.experimental import pallas as pl
from jax.experimental.pallas import tpu as pltpu


def _round_up(x, m):
    return (x + m - 1) // m * m


def _pad_to(a, shape):
    return jnp.pad(a, [(0, s - d) for d, s in zip(a.shape, shape)])


def cbow_kernel(idx_ref, m_ref, b1_ref, w2_ref, b2_ref, out_ref, hid_ref):
    """One (batch-tile, vocab-tile) grid step of the fused CBOW forward.

    NOTE: hid_ref scratch is written on the first vocab tile and reused by all
    later vocab tiles of the same batch tile.  This relies on the vocab axis
    being the innermost, sequentially executed ("arbitrary") grid axis — do not
    reorder the grid or mark that axis "parallel".
    """

    @pl.when(pl.program_id(1) == 0)
    def _compute_hidden():
        tb, n_ctx = idx_ref.shape
        vin = m_ref.shape[1]
        h_pad = hid_ref.shape[1]

        iota_v = jax.lax.broadcasted_iota(jnp.int32, (tb, vin), 1)
        acc = jnp.zeros((tb, h_pad), jnp.float32)
        for c in range(n_ctx):                             # 2*window, static unroll
            idx_c = idx_ref[:, c:c + 1]                    # (TB, 1) int32
            # One-hot built directly in bf16 (no fp32 intermediate).
            onehot = (iota_v == idx_c).astype(jnp.bfloat16)
            # Fused gather + Linear-1: M[c] = emb @ W1[c] (precomputed), so
            # onehot @ M[c] == emb[idx_c] @ W1[c]; exact row selection with
            # fp32 accumulation on the MXU.
            acc = acc + jnp.dot(onehot, m_ref[c],
                                preferred_element_type=jnp.float32)
        hid = jnp.maximum(acc + b1_ref[...], 0.0)          # bias + ReLU, fp32
        hid_ref[...] = hid.astype(jnp.bfloat16)            # reused by all vocab tiles

    logits = jnp.dot(hid_ref[...], w2_ref[...], preferred_element_type=jnp.float32)
    out_ref[...] = (logits + b2_ref[...]).astype(out_ref.dtype)


@jax.jit
def cbow_forward(inputs, emb_table, w1_t, b1, w2_t, b2):
    """inputs: (B, 2W) int32 context indices. Returns (B, V) fp32 logits.

    Weights in "math" layout (PyTorch Linear weights already transposed):
      emb_table: (V, E); w1_t: (2W*E, H); b1: (H,); w2_t: (H, V); b2: (V,)
    """
    B, C = inputs.shape
    Vin, E = emb_table.shape
    D, H = w1_t.shape
    V = w2_t.shape[1]
    assert D == C * E

    # ---- TPU-friendly padding / tiling -----------------------------------
    B8 = _round_up(B, 8)
    TB = min(256, B8)                       # bigger batch tile -> fewer w2 re-streams
    B_pad = _round_up(B8, TB)
    H_pad = _round_up(max(H, 128), 128)     # lane-dense hidden
    Vin_pad = _round_up(Vin, 8)
    V_pad = _round_up(V, 128)
    TV = V_pad if V_pad <= 2048 else 2048   # lane-dense, 256-aligned vocab tile
    V_pad = _round_up(V_pad, TV)

    idx_p = _pad_to(inputs.astype(jnp.int32), (B_pad, C))

    # Fold embedding into Linear-1: M[c] = emb_bf16 @ W1_bf16[c], shape (Vin, H).
    # bf16 rounding of the folded product is the only numerics change.
    w1_3d = w1_t.reshape(C, E, H).astype(jnp.bfloat16)
    m = jnp.einsum('ve,ceh->cvh', emb_table.astype(jnp.bfloat16), w1_3d,
                   preferred_element_type=jnp.float32).astype(jnp.bfloat16)
    m_p = _pad_to(m, (C, Vin_pad, H_pad))                  # zero-padded rows/cols

    b1_p = _pad_to(b1.reshape(1, H), (1, H_pad)).astype(jnp.float32)
    # Zero-padded hidden rows -> padded hidden units contribute nothing.
    w2_p = _pad_to(w2_t, (H_pad, V_pad)).astype(jnp.bfloat16)
    b2_p = _pad_to(b2.reshape(1, V), (1, V_pad)).astype(jnp.float32)

    grid = (B_pad // TB, V_pad // TV)

    out = pl.pallas_call(
        cbow_kernel,
        out_shape=jax.ShapeDtypeStruct((B_pad, V_pad), jnp.float32),
        grid=grid,
        in_specs=[
            pl.BlockSpec((TB, C), lambda i, j: (i, 0)),                 # token ids
            pl.BlockSpec((C, Vin_pad, H_pad), lambda i, j: (0, 0, 0)),  # folded emb@W1
            pl.BlockSpec((1, H_pad), lambda i, j: (0, 0)),              # Linear-1 bias
            pl.BlockSpec((H_pad, TV), lambda i, j: (0, j)),             # Linear-2 weight
            pl.BlockSpec((1, TV), lambda i, j: (0, j)),                 # Linear-2 bias
        ],
        out_specs=pl.BlockSpec((TB, TV), lambda i, j: (i, j)),
        scratch_shapes=[pltpu.VMEM((TB, H_pad), jnp.bfloat16)],
        compiler_params=pltpu.CompilerParams(
            dimension_semantics=("parallel", "arbitrary")),
    )(idx_p, m_p, b1_p, w2_p, b2_p)

    return out[:B, :V]


if __name__ == "__main__":
    # Module hyperparameters (consistent with CBOW.__init__ defaults)
    vocab_size = 256
    embed_size = 64
    window_size = 3
    hidden_size = 64
    batch = 8
    ctx_len = 2 * window_size            # 6 context tokens per example
    in_dim = ctx_len * embed_size        # 384

    key = jax.random.PRNGKey(0)
    k_emb, k_w1, k_b1, k_w2, k_b2, k_in = jax.random.split(key, 6)

    emb_table = jax.random.normal(k_emb, (vocab_size, embed_size), jnp.float32)
    lim1 = 1.0 / jnp.sqrt(in_dim)
    w1_t = jax.random.uniform(k_w1, (in_dim, hidden_size), jnp.float32, -lim1, lim1)
    b1 = jax.random.uniform(k_b1, (hidden_size,), jnp.float32, -lim1, lim1)
    lim2 = 1.0 / jnp.sqrt(hidden_size)
    w2_t = jax.random.uniform(k_w2, (hidden_size, vocab_size), jnp.float32, -lim2, lim2)
    b2 = jax.random.uniform(k_b2, (vocab_size,), jnp.float32, -lim2, lim2)

    inputs = jax.random.randint(k_in, (batch, ctx_len), 0, vocab_size, jnp.int32)

    out = cbow_forward(inputs, emb_table, w1_t, b1, w2_t, b2)
    out = jax.block_until_ready(out)

    # bf16-consistent pure-JAX reference that mirrors the kernel's folded math
    # (M = emb_bf16 @ W1_bf16 rounded to bf16, fp32 accumulation), so the
    # tolerance check is tight.
    m_ref = jnp.einsum(
        've,ceh->cvh',
        emb_table.astype(jnp.bfloat16),
        w1_t.reshape(ctx_len, embed_size, hidden_size).astype(jnp.bfloat16),
        preferred_element_type=jnp.float32).astype(jnp.bfloat16).astype(jnp.float32)
    hid_pre = jnp.zeros((batch, hidden_size), jnp.float32)
    for c in range(ctx_len):
        hid_pre = hid_pre + m_ref[c, inputs[:, c], :]
    hid_r = jnp.maximum(hid_pre + b1, 0.0)
    hid_r = hid_r.astype(jnp.bfloat16).astype(jnp.float32)
    w2_bf = w2_t.astype(jnp.bfloat16).astype(jnp.float32)
    ref = hid_r @ w2_bf + b2

    assert out.shape == (batch, vocab_size)
    assert jnp.allclose(out, ref, atol=1e-2, rtol=1e-2), \
        float(jnp.max(jnp.abs(out - ref)))

    print("KERNEL_OK")
</pallas_src>

<mosaic_0001>
module attributes {stable_mosaic.version = 11 : i64} {
  func.func @cbow_kernel(%arg0: i32, %arg1: i32, %arg2: memref<8x6xi32, #tpu.memory_space<vmem>>, %arg3: memref<6x256x128xbf16, #tpu.memory_space<vmem>>, %arg4: memref<1x128xf32, #tpu.memory_space<vmem>>, %arg5: memref<128x256xbf16, #tpu.memory_space<vmem>>, %arg6: memref<1x256xf32, #tpu.memory_space<vmem>>, %arg7: memref<8x256xf32, #tpu.memory_space<vmem>>, %arg8: memref<8x128xbf16, #tpu.memory_space<vmem>>) attributes {dimension_semantics = [#tpu.dimension_semantics<parallel>, #tpu.dimension_semantics<arbitrary>], iteration_bounds = array<i64: 1, 1>, scalar_prefetch = 0 : i64, scratch_operands = 1 : i64, tpu.core_type = #tpu.core_type<tc>, window_params = [{transform_indices = @transform_0, window_bounds = array<i64: 8, 6>}, {pipeline_mode = #tpu.pipeline_mode<synchronous>, transform_indices = @transform_1, window_bounds = array<i64: 6, 256, 128>}, {pipeline_mode = #tpu.pipeline_mode<synchronous>, transform_indices = @transform_2, window_bounds = array<i64: 1, 128>}, {transform_indices = @transform_3, window_bounds = array<i64: 128, 256>}, {transform_indices = @transform_4, window_bounds = array<i64: 1, 256>}, {transform_indices = @transform_5, window_bounds = array<i64: 8, 256>}]} {
    %c0_i32 = arith.constant 0 : i32
    %0 = arith.cmpi eq, %arg1, %c0_i32 : i32
    %1 = arith.extui %0 : i1 to i32
    %c0_i32_0 = arith.constant 0 : i32
    %2 = arith.cmpi ne, %1, %c0_i32_0 : i32
    scf.if %2 {
      %10 = tpu.iota {dimensions = array<i32: 1>} : vector<8x256xi32>
      %cst_8 = arith.constant 0.000000e+00 : f32
      %11 = vector.broadcast %cst_8 : f32 to vector<8x128xf32>
      %c0_9 = arith.constant 0 : index
      %c0_10 = arith.constant 0 : index
      %12 = vector.load %arg2[%c0_9, %c0_10] : memref<8x6xi32, #tpu.memory_space<vmem>>, vector<8x1xi32>
      %13 = vector.broadcast %12 : vector<8x1xi32> to vector<8x256xi32>
      %14 = arith.cmpi eq, %10, %13 : vector<8x256xi32>
      %15 = arith.extui %14 : vector<8x256xi1> to vector<8x256xi32>
      %16 = arith.sitofp %15 : vector<8x256xi32> to vector<8x256xf32>
      %17 = arith.truncf %16 : vector<8x256xf32> to vector<8x256xbf16>
      %c0_11 = arith.constant 0 : index
      %c0_12 = arith.constant 0 : index
      %c0_13 = arith.constant 0 : index
      %18 = vector.load %arg3[%c0_11, %c0_12, %c0_13] : memref<6x256x128xbf16, #tpu.memory_space<vmem>>, vector<1x256x128xbf16>
      %19 = vector.shape_cast %18 : vector<1x256x128xbf16> to vector<256x128xbf16>
      %cst_14 = arith.constant dense<0.000000e+00> : vector<8x128xf32>
      %20 = tpu.matmul %17, %19, %cst_14 {dimension_numbers = #tpu.dot_dimension_numbers<[1], [0], [0], [1], [0, 0, 1, 1], [], []>} : vector<8x256xbf16>, vector<256x128xbf16>, vector<8x128xf32> -> vector<8x128xf32>
      %21 = arith.addf %11, %20 : vector<8x128xf32>
      %c0_15 = arith.constant 0 : index
      %c1 = arith.constant 1 : index
      %22 = vector.load %arg2[%c0_15, %c1] : memref<8x6xi32, #tpu.memory_space<vmem>>, vector<8x1xi32>
      %23 = vector.broadcast %22 : vector<8x1xi32> to vector<8x256xi32>
      %24 = arith.cmpi eq, %10, %23 : vector<8x256xi32>
      %25 = arith.extui %24 : vector<8x256xi1> to vector<8x256xi32>
      %26 = arith.sitofp %25 : vector<8x256xi32> to vector<8x256xf32>
      %27 = arith.truncf %26 : vector<8x256xf32> to vector<8x256xbf16>
      %c1_16 = arith.constant 1 : index
      %c0_17 = arith.constant 0 : index
      %c0_18 = arith.constant 0 : index
      %28 = vector.load %arg3[%c1_16, %c0_17, %c0_18] : memref<6x256x128xbf16, #tpu.memory_space<vmem>>, vector<1x256x128xbf16>
      %29 = vector.shape_cast %28 : vector<1x256x128xbf16> to vector<256x128xbf16>
      %cst_19 = arith.constant dense<0.000000e+00> : vector<8x128xf32>
      %30 = tpu.matmul %27, %29, %cst_19 {dimension_numbers = #tpu.dot_dimension_numbers<[1], [0], [0], [1], [0, 0, 1, 1], [], []>} : vector<8x256xbf16>, vector<256x128xbf16>, vector<8x128xf32> -> vector<8x128xf32>
      %31 = arith.addf %21, %30 : vector<8x128xf32>
      %c0_20 = arith.constant 0 : index
      %c2 = arith.constant 2 : index
      %32 = vector.load %arg2[%c0_20, %c2] : memref<8x6xi32, #tpu.memory_space<vmem>>, vector<8x1xi32>
      %33 = vector.broadcast %32 : vector<8x1xi32> to vector<8x256xi32>
      %34 = arith.cmpi eq, %10, %33 : vector<8x256xi32>
      %35 = arith.extui %34 : vector<8x256xi1> to vector<8x256xi32>
      %36 = arith.sitofp %35 : vector<8x256xi32> to vector<8x256xf32>
      %37 = arith.truncf %36 : vector<8x256xf32> to vector<8x256xbf16>
      %c2_21 = arith.constant 2 : index
      %c0_22 = arith.constant 0 : index
      %c0_23 = arith.constant 0 : index
      %38 = vector.load %arg3[%c2_21, %c0_22, %c0_23] : memref<6x256x128xbf16, #tpu.memory_space<vmem>>, vector<1x256x128xbf16>
      %39 = vector.shape_cast %38 : vector<1x256x128xbf16> to vector<256x128xbf16>
      %cst_24 = arith.constant dense<0.000000e+00> : vector<8x128xf32>
      %40 = tpu.matmul %37, %39, %cst_24 {dimension_numbers = #tpu.dot_dimension_numbers<[1], [0], [0], [1], [0, 0, 1, 1], [], []>} : vector<8x256xbf16>, vector<256x128xbf16>, vector<8x128xf32> -> vector<8x128xf32>
      %41 = arith.addf %31, %40 : vector<8x128xf32>
      %c0_25 = arith.constant 0 : index
      %c3 = arith.constant 3 : index
      %42 = vector.load %arg2[%c0_25, %c3] : memref<8x6xi32, #tpu.memory_space<vmem>>, vector<8x1xi32>
      %43 = vector.broadcast %42 : vector<8x1xi32> to vector<8x256xi32>
      %44 = arith.cmpi eq, %10, %43 : vector<8x256xi32>
      %45 = arith.extui %44 : vector<8x256xi1> to vector<8x256xi32>
      %46 = arith.sitofp %45 : vector<8x256xi32> to vector<8x256xf32>
      %47 = arith.truncf %46 : vector<8x256xf32> to vector<8x256xbf16>
      %c3_26 = arith.constant 3 : index
      %c0_27 = arith.constant 0 : index
      %c0_28 = arith.constant 0 : index
      %48 = vector.load %arg3[%c3_26, %c0_27, %c0_28] : memref<6x256x128xbf16, #tpu.memory_space<vmem>>, vector<1x256x128xbf16>
      %49 = vector.shape_cast %48 : vector<1x256x128xbf16> to vector<256x128xbf16>
      %cst_29 = arith.constant dense<0.000000e+00> : vector<8x128xf32>
      %50 = tpu.matmul %47, %49, %cst_29 {dimension_numbers = #tpu.dot_dimension_numbers<[1], [0], [0], [1], [0, 0, 1, 1], [], []>} : vector<8x256xbf16>, vector<256x128xbf16>, vector<8x128xf32> -> vector<8x128xf32>
      %51 = arith.addf %41, %50 : vector<8x128xf32>
      %c0_30 = arith.constant 0 : index
      %c4 = arith.constant 4 : index
      %52 = vector.load %arg2[%c0_30, %c4] : memref<8x6xi32, #tpu.memory_space<vmem>>, vector<8x1xi32>
      %53 = vector.broadcast %52 : vector<8x1xi32> to vector<8x256xi32>
      %54 = arith.cmpi eq, %10, %53 : vector<8x256xi32>
      %55 = arith.extui %54 : vector<8x256xi1> to vector<8x256xi32>
      %56 = arith.sitofp %55 : vector<8x256xi32> to vector<8x256xf32>
      %57 = arith.truncf %56 : vector<8x256xf32> to vector<8x256xbf16>
      %c4_31 = arith.constant 4 : index
      %c0_32 = arith.constant 0 : index
      %c0_33 = arith.constant 0 : index
      %58 = vector.load %arg3[%c4_31, %c0_32, %c0_33] : memref<6x256x128xbf16, #tpu.memory_space<vmem>>, vector<1x256x128xbf16>
      %59 = vector.shape_cast %58 : vector<1x256x128xbf16> to vector<256x128xbf16>
      %cst_34 = arith.constant dense<0.000000e+00> : vector<8x128xf32>
      %60 = tpu.matmul %57, %59, %cst_34 {dimension_numbers = #tpu.dot_dimension_numbers<[1], [0], [0], [1], [0, 0, 1, 1], [], []>} : vector<8x256xbf16>, vector<256x128xbf16>, vector<8x128xf32> -> vector<8x128xf32>
      %61 = arith.addf %51, %60 : vector<8x128xf32>
      %c0_35 = arith.constant 0 : index
      %c5 = arith.constant 5 : index
      %62 = vector.load %arg2[%c0_35, %c5] : memref<8x6xi32, #tpu.memory_space<vmem>>, vector<8x1xi32>
      %63 = vector.broadcast %62 : vector<8x1xi32> to vector<8x256xi32>
      %64 = arith.cmpi eq, %10, %63 : vector<8x256xi32>
      %65 = arith.extui %64 : vector<8x256xi1> to vector<8x256xi32>
      %66 = arith.sitofp %65 : vector<8x256xi32> to vector<8x256xf32>
      %67 = arith.truncf %66 : vector<8x256xf32> to vector<8x256xbf16>
      %c5_36 = arith.constant 5 : index
      %c0_37 = arith.constant 0 : index
      %c0_38 = arith.constant 0 : index
      %68 = vector.load %arg3[%c5_36, %c0_37, %c0_38] : memref<6x256x128xbf16, #tpu.memory_space<vmem>>, vector<1x256x128xbf16>
      %69 = vector.shape_cast %68 : vector<1x256x128xbf16> to vector<256x128xbf16>
      %cst_39 = arith.constant dense<0.000000e+00> : vector<8x128xf32>
      %70 = tpu.matmul %67, %69, %cst_39 {dimension_numbers = #tpu.dot_dimension_numbers<[1], [0], [0], [1], [0, 0, 1, 1], [], []>} : vector<8x256xbf16>, vector<256x128xbf16>, vector<8x128xf32> -> vector<8x128xf32>
      %71 = arith.addf %61, %70 : vector<8x128xf32>
      %c0_40 = arith.constant 0 : index
      %c0_41 = arith.constant 0 : index
      %72 = vector.load %arg4[%c0_40, %c0_41] : memref<1x128xf32, #tpu.memory_space<vmem>>, vector<1x128xf32>
      %73 = vector.broadcast %72 : vector<1x128xf32> to vector<8x128xf32>
      %74 = arith.addf %71, %73 : vector<8x128xf32>
      %cst_42 = arith.constant 0.000000e+00 : f32
      %75 = vector.broadcast %cst_42 : f32 to vector<8x128xf32>
      %76 = arith.maximumf %74, %75 : vector<8x128xf32>
      %77 = arith.truncf %76 : vector<8x128xf32> to vector<8x128xbf16>
      %c0_43 = arith.constant 0 : index
      %c0_44 = arith.constant 0 : index
      %78 = vector.load %arg8[%c0_43, %c0_44] : memref<8x128xbf16, #tpu.memory_space<vmem>>, vector<8x128xbf16>
      tpu.vector_store %arg8[%c0_43, %c0_44], %77 {strides = array<i32>} : memref<8x128xbf16, #tpu.memory_space<vmem>>, vector<8x128xbf16>,
    } else {
    }
    %c0 = arith.constant 0 : index
    %c0_1 = arith.constant 0 : index
    %3 = vector.load %arg8[%c0, %c0_1] : memref<8x128xbf16, #tpu.memory_space<vmem>>, vector<8x128xbf16>
    %c0_2 = arith.constant 0 : index
    %c0_3 = arith.constant 0 : index
    %4 = vector.load %arg5[%c0_2, %c0_3] : memref<128x256xbf16, #tpu.memory_space<vmem>>, vector<128x256xbf16>
    %cst = arith.constant dense<0.000000e+00> : vector<8x256xf32>
    %5 = tpu.matmul %3, %4, %cst {dimension_numbers = #tpu.dot_dimension_numbers<[1], [0], [0], [1], [0, 0, 1, 1], [], []>} : vector<8x128xbf16>, vector<128x256xbf16>, vector<8x256xf32> -> vector<8x256xf32>
    %c0_4 = arith.constant 0 : index
    %c0_5 = arith.constant 0 : index
    %6 = vector.load %arg6[%c0_4, %c0_5] : memref<1x256xf32, #tpu.memory_space<vmem>>, vector<1x256xf32>
    %7 = vector.broadcast %6 : vector<1x256xf32> to vector<8x256xf32>
    %8 = arith.addf %5, %7 : vector<8x256xf32>
    %c0_6 = arith.constant 0 : index
    %c0_7 = arith.constant 0 : index
    %9 = vector.load %arg7[%c0_6, %c0_7] : memref<8x256xf32, #tpu.memory_space<vmem>>, vector<8x256xf32>
    tpu.vector_store %arg7[%c0_6, %c0_7], %8 {strides = array<i32>} : memref<8x256xf32, #tpu.memory_space<vmem>>, vector<8x256xf32>,
    return
  }
  func.func @transform_0(%arg0: i32, %arg1: i32) -> (i32, i32) {
    %c0_i32 = arith.constant 0 : i32
    %c0_i32_0 = arith.constant 0 : i32
    return %arg0, %c0_i32 : i32, i32
  }
  func.func @transform_1(%arg0: i32, %arg1: i32) -> (i32, i32, i32) {
    %c0_i32 = arith.constant 0 : i32
    %c0_i32_0 = arith.constant 0 : i32
    %c0_i32_1 = arith.constant 0 : i32
    %c0_i32_2 = arith.constant 0 : i32
    return %c0_i32, %c0_i32_0, %c0_i32_1 : i32, i32, i32
  }
  func.func @transform_2(%arg0: i32, %arg1: i32) -> (i32, i32) {
    %c0_i32 = arith.constant 0 : i32
    %c0_i32_0 = arith.constant 0 : i32
    %c0_i32_1 = arith.constant 0 : i32
    return %c0_i32, %c0_i32_0 : i32, i32
  }
  func.func @transform_3(%arg0: i32, %arg1: i32) -> (i32, i32) {
    %c0_i32 = arith.constant 0 : i32
    %c0_i32_0 = arith.constant 0 : i32
    return %c0_i32, %arg1 : i32, i32
  }
  func.func @transform_4(%arg0: i32, %arg1: i32) -> (i32, i32) {
    %c0_i32 = arith.constant 0 : i32
    %c0_i32_0 = arith.constant 0 : i32
    return %c0_i32, %arg1 : i32, i32
  }
  func.func @transform_5(%arg0: i32, %arg1: i32) -> (i32, i32) {
    %c0_i32 = arith.constant 0 : i32
    return %arg0, %arg1 : i32, i32
  }
}

</mosaic_0001>

<bundles_post_ra>
// kernel: cbow_forward.1
= control target key start
LH: loop header
LB: loop body
LE: loop exit
PB: predicated region body
PF: predicated region fallthrough
CT: control target
= control target key end

     0   :  { %v1889_v2 = vmov 1   ;;  %v1890_v3 = vmov 2   ;;  %v1891_v8 = vmov 0   ;;  %v1892_v9 = vmov 3   ;;  %s2333_s0 = inlined_call_operand.vmem [shape: s32[8,6], index: 0, kind: input, shape index: {}]   ;;  %s2334_s1 = inlined_call_operand.vmem [shape: bf16[6,256,128], index: 1, kind: input, shape index: {}]   ;;  %s2335_s2 = inlined_call_operand.vmem [shape: f32[1,128], index: 2, kind: input, shape index: {}]   ;;  %s2336_s3 = inlined_call_operand.vmem [shape: bf16[128,256], index: 3, kind: input, shape index: {}]   ;;  %s2337_s4 = inlined_call_operand.vmem [shape: f32[1,256], index: 4, kind: input, shape index: {}]   ;;  %s2338_s5 = inlined_call_operand.hbm [shape: f32[8,256], index: 5, kind: output, shape index: {}]  }
   0x1   :  { %v29_v0 = vld [vmem:[%s2333_s0] sm:$0xff]  ;;  %1739 = vset.pattern.permute.xlu0 %v1889_v2  ;;  %1741 = vset.pattern.permute.xlu1 %v1890_v3  ;;  %v1747_v5 = vld [vmem:[%s2334_s1 + $0xc8] sm:$0xff]   ;;  %v1751_v11 = vld [vmem:[%s2334_s1 + $0xd0] sm:$0xff]   ;;  %v1893_v15 = vmov 4   ;;  %v1894_v16 = vmov 5  }
   0x2   :  { %v1745_v1 = vld [vmem:[%s2334_s1 + $0xc0] sm:$0xff]   ;;  %74 = vperm.xlu0 %1739, %v29_v0   ;;  %390 = vperm.xlu1 %1741, %v29_v0   ;;  %v1748_v6 = vld [vmem:[%s2334_s1 + $0x88] sm:$0xff]   ;;  %v1752_v12 = vld [vmem:[%s2334_s1 + $0x90] sm:$0xff]  }
   0x3   :  { %v1746_v4 = vld [vmem:[%s2334_s1 + $0x80] sm:$0xff]   ;;  %1599 = vmatprep.subr.bf16.mxu0 %v1745_v1  ;;  %v1753_v13 = vld [vmem:[%s2334_s1 + $0x48] sm:$0xff]   ;;  %v1755_v17 = vld [vmem:[%s2334_s1 + $0xd8] sm:$0xff]  }
   0x4   :  { %1600 = vmatpush3.bf16.msra.mxu0 %v1746_v4  ;;  %v1749_v7 = vld [vmem:[%s2334_s1 + $0x40] sm:$0xff]   ;;  %v1754_v14 = vld [vmem:[%s2334_s1 + $0x8] sm:$0xff]   ;;  %v1756_v18 = vld [vmem:[%s2334_s1 + $0x98] sm:$0xff]  }
   0x5   :  { %1601 = vmatprep.subr.bf16.mxu0 %v1747_v5  ;;  %v1750_v10 = vld [vmem:[%s2334_s1] sm:$0xff]   ;;  %1621 = vmatprep.subr.bf16.mxu1 %v1749_v7  ;;  %v1757_v19 = vld [vmem:[%s2334_s1 + $0x50] sm:$0xff]   ;;  %v1761_v23 = vld [vmem:[%s2334_s1 + $0x58] sm:$0xff]  }
   0x6   :  { %1740 = vset.pattern.permute.xlu0 %v1891_v8  ;;  %1742 = vset.pattern.permute.xlu1 %v1892_v9  ;;  %v1758_v20 = vld [vmem:[%s2334_s1 + $0x10] sm:$0xff]   ;;  %v1759_v21 = vld [vmem:[%s2334_s1 + $0xe0] sm:$0xff]   ;;  %v1762_v24 = vld [vmem:[%s2334_s1 + $0x18] sm:$0xff]  }
   0x7   :  { %31 = vperm.xlu0 %1740, %v29_v0   ;;  %571 = vperm.xlu1 %1742, %v29_v0   ;;  %v1760_v22 = vld [vmem:[%s2334_s1 + $0xa0] sm:$0xff]   ;;  %v1763_v25 = vld [vmem:[%s2334_s1 + $0xe8] sm:$0xff]   ;;  %v1767_v29 = vld [vmem:[%s2334_s1 + $0xf0] sm:$0xff]  }
   0x8   :  { %1602 = vmatpush3.bf16.msra.mxu0 %v1748_v6  ;;  %1622 = vmatpush3.bf16.msra.mxu1 %v1750_v10  ;;  %v1764_v26 = vld [vmem:[%s2334_s1 + $0xa8] sm:$0xff]   ;;  %v1765_v27 = vld [vmem:[%s2334_s1 + $0x60] sm:$0xff]   ;;  %v1768_v30 = vld [vmem:[%s2334_s1 + $0xb0] sm:$0xff]  }
   0x9   :  { %1603 = vmatprep.subr.bf16.mxu0 %v1751_v11  ;;  %1623 = vmatprep.subr.bf16.mxu1 %v1753_v13  ;;  %v1766_v28 = vld [vmem:[%s2334_s1 + $0x20] sm:$0xff]   ;;  %v1769_v31 = vld [vmem:[%s2334_s1 + $0x68] sm:$0xff]   ;;  %v1771_v33 = vld [vmem:[%s2334_s1 + $0xf8] sm:$0xff]  }
   0xa   :  { %v1770_v32 = vld [vmem:[%s2334_s1 + $0x28] sm:$0xff]   ;;  %v1772_v34 = vld [vmem:[%s2334_s1 + $0xb8] sm:$0xff]   ;;  %v1773_v35 = vld [vmem:[%s2334_s1 + $0x70] sm:$0xff]  }
   0xb   :  { %1743 = vset.pattern.permute.xlu1 %v1893_v15  ;;  %1744 = vset.pattern.permute.xlu0 %v1894_v16  ;;  %v1774_v36 = vld [vmem:[%s2334_s1 + $0x30] sm:$0xff]   ;;  %v1775_v37 = vld [vmem:[%s2334_s1 + $0x140] sm:$0xff]   ;;  %v1776_v38 = vld [vmem:[%s2334_s1 + $0x78] sm:$0xff]  }
   0xc   :  { %752 = vperm.xlu1 %1743, %v29_v0   ;;  %933 = vperm.xlu0 %1744, %v29_v0   ;;  %v1778_v39 = vld [vmem:[%s2334_s1 + $0x38] sm:$0xff]   ;;  %v1781_v40 = vld [vmem:[%s2334_s1 + $0x1c0] sm:$0xff]  }
   0xd   :  { %1604 = vmatpush3.bf16.msra.mxu0 %v1752_v12  ;;  %1624 = vmatpush3.bf16.msra.mxu1 %v1754_v14 }
   0xe   :  { %1605 = vmatprep.subr.bf16.mxu0 %v1755_v17  ;;  %1625 = vmatprep.subr.bf16.mxu1 %v1757_v19 }
  0x11   :  { %1606 = vmatpush3.bf16.msra.mxu0 %v1756_v18  ;;  %1626 = vmatpush3.bf16.msra.mxu1 %v1758_v20 }
  0x12   :  { %1607 = vmatprep.subr.bf16.mxu0 %v1759_v21  ;;  %1627 = vmatprep.subr.bf16.mxu1 %v1761_v23 }
  0x15   :  { %1608 = vmatpush3.bf16.msra.mxu0 %v1760_v22  ;;  %1628 = vmatpush3.bf16.msra.mxu1 %v1762_v24 }
  0x16   :  { %1609 = vmatprep.subr.bf16.mxu0 %v1763_v25  ;;  %1629 = vmatprep.subr.bf16.mxu1 %v1765_v27 }
  0x19   :  { %1610 = vmatpush3.bf16.msra.mxu0 %v1764_v26  ;;  %1630 = vmatpush3.bf16.msra.mxu1 %v1766_v28 }
  0x1a   :  { %1611 = vmatprep.subr.bf16.mxu0 %v1767_v29  ;;  %1631 = vmatprep.subr.bf16.mxu1 %v1769_v31 }
  0x1d   :  { %1612 = vmatpush3.bf16.msra.mxu0 %v1768_v30  ;;  %1632 = vmatpush3.bf16.msra.mxu1 %v1770_v32 }
  0x1e   :  { %1613 = vmatprep.subr.bf16.mxu0 %v1771_v33  ;;  %1633 = vmatprep.subr.bf16.mxu1 %v1773_v35 }
  0x21   :  { %1614 = vmatpush3.bf16.msra.mxu0 %v1772_v34  ;;  %1634 = vmatpush3.bf16.msra.mxu1 %v1774_v36 }
  0x22   :  { %1643 = vmatprep.subr.bf16.mxu0 %v1775_v37  ;;  %1635 = vmatprep.subr.bf16.mxu1 %v1776_v38 }
  0x25   :  { %1636 = vmatpush3.bf16.msra.mxu1 %v1778_v39 }
  0x26   :  { %1665 = vmatprep.subr.bf16.mxu1 %v1781_v40 }
  0x27   :  { %10 = vsyncpa [#allocation4], 0  ;;  %v26_v41 = vlaneseq  ;;  %v1777_v46 = vld [vmem:[%s2334_s1 + $0x100] sm:$0xff]   ;;  %v1779_v47 = vld [vmem:[%s2334_s1 + $0x148] sm:$0xff]   ;;  %v1895_v48 = vmov 1.0|1.0  }
  0x28   :  { %v1780_v51 = vld [vmem:[%s2334_s1 + $0x108] sm:$0xff]   ;;  %v1782_v52 = vld [vmem:[%s2334_s1 + $0x180] sm:$0xff]   ;;  %v1783_v53 = vld [vmem:[%s2334_s1 + $0x150] sm:$0xff]   ;;  %s1896_s11 = smov [#allocation3]  }
  0x29   :  { %v2034_v42 = vand.u32 127, %v26_v41  ;;  %v1785_v54 = vld [vmem:[%s2334_s1 + $0x1c8] sm:$0xff]   ;;  %v1784_v55 = vld [vmem:[%s2334_s1 + $0x110] sm:$0xff]   ;;  %v1787_v57 = vld [vmem:[%s2334_s1 + $0x158] sm:$0xff]  }
  0x2a   :  { %v1786_v56 = vld [vmem:[%s2334_s1 + $0x188] sm:$0xff]   ;;  %v1789_v58 = vld [vmem:[%s2334_s1 + $0x1d0] sm:$0xff]   ;;  %v1788_v59 = vld [vmem:[%s2334_s1 + $0x118] sm:$0xff]  }
  0x2b   :  { %v2037_v43 = vadd.s32 128, %v2034_v42  ;;  %v1790_v60 = vld [vmem:[%s2334_s1 + $0x190] sm:$0xff]   ;;  %v1791_v61 = vld [vmem:[%s2334_s1 + $0x160] sm:$0xff]   ;;  %v1793_v62 = vld [vmem:[%s2334_s1 + $0x1d8] sm:$0xff]  }
  0x2c   :  { %v1792_v63 = vld [vmem:[%s2334_s1 + $0x120] sm:$0xff]   ;;  %v1794_v0 = vld [vmem:[%s2334_s1 + $0x198] sm:$0xff]   ;;  %v1795_v1 = vld [vmem:[%s2334_s1 + $0x168] sm:$0xff]  }
  0x2d   :  { %v1797_v2 = vld [vmem:[%s2334_s1 + $0x1e0] sm:$0xff]   ;;  %v1796_v3 = vld [vmem:[%s2334_s1 + $0x128] sm:$0xff]   ;;  %v1799_v5 = vld [vmem:[%s2334_s1 + $0x170] sm:$0xff]  }
  0x2e   :  { %v1798_v4 = vld [vmem:[%s2334_s1 + $0x1a0] sm:$0xff]   ;;  %v1801_v6 = vld [vmem:[%s2334_s1 + $0x1e8] sm:$0xff]   ;;  %v1800_v7 = vld [vmem:[%s2334_s1 + $0x130] sm:$0xff]  }
  0x2f   :  { %v1802_v9 = vld [vmem:[%s2334_s1 + $0x1a8] sm:$0xff]   ;;  %v1803_v10 = vld [vmem:[%s2334_s1 + $0x178] sm:$0xff]   ;;  %v1805_v11 = vld [vmem:[%s2334_s1 + $0x1f0] sm:$0xff]  }
  0x30   :  { %v1804_v13 = vld [vmem:[%s2334_s1 + $0x138] sm:$0xff]   ;;  %v1806_v14 = vld [vmem:[%s2334_s1 + $0x1b0] sm:$0xff]   ;;  %v1807_v15 = vld [vmem:[%s2334_s1 + $0x240] sm:$0xff]  }
  0x31   :  { %v1808_v16 = vld [vmem:[%s2334_s1 + $0x1f8] sm:$0xff]   ;;  %v1809_v17 = vld [vmem:[%s2334_s1 + $0x200] sm:$0xff]   ;;  %v1811_v19 = vld [vmem:[%s2334_s1 + $0x248] sm:$0xff]  }
  0x32   :  { %v1810_v18 = vld [vmem:[%s2334_s1 + $0x1b8] sm:$0xff]   ;;  %v1813_v21 = vld [vmem:[%s2334_s1 + $0x2c0] sm:$0xff]   ;;  %v1812_v22 = vld [vmem:[%s2334_s1 + $0x208] sm:$0xff]  }
  0x33   :  { %v1814_v23 = vld [vmem:[%s2334_s1 + $0x280] sm:$0xff]   ;;  %v1815_v24 = vld [vmem:[%s2334_s1 + $0x250] sm:$0xff]   ;;  %v1817_v25 = vld [vmem:[%s2334_s1 + $0x2c8] sm:$0xff]  }
  0x34   :  { %v1816_v26 = vld [vmem:[%s2334_s1 + $0x210] sm:$0xff]   ;;  %v1818_v27 = vld [vmem:[%s2334_s1 + $0x288] sm:$0xff]   ;;  %v1819_v28 = vld [vmem:[%s2334_s1 + $0x258] sm:$0xff]  }
  0x35   :  { %v1821_v29 = vld [vmem:[%s2334_s1 + $0x2d0] sm:$0xff]   ;;  %v1820_v30 = vld [vmem:[%s2334_s1 + $0x218] sm:$0xff]   ;;  %v1823_v32 = vld [vmem:[%s2334_s1 + $0x260] sm:$0xff]  }
  0x36   :  { %v1822_v31 = vld [vmem:[%s2334_s1 + $0x290] sm:$0xff]   ;;  %v1825_v33 = vld [vmem:[%s2334_s1 + $0x2d8] sm:$0xff]   ;;  %v1824_v34 = vld [vmem:[%s2334_s1 + $0x220] sm:$0xff]  }
  0x37   :  { %v1826_v35 = vld [vmem:[%s2334_s1 + $0x298] sm:$0xff]   ;;  %v1827_v36 = vld [vmem:[%s2334_s1 + $0x268] sm:$0xff]   ;;  %v1829_v37 = vld [vmem:[%s2334_s1 + $0x2e0] sm:$0xff]  }
  0x38   :  { %v1828_v38 = vld [vmem:[%s2334_s1 + $0x228] sm:$0xff]   ;;  %v1830_v39 = vld [vmem:[%s2334_s1 + $0x2a0] sm:$0xff]   ;;  %v1831_v40 = vld [vmem:[%s2334_s1 + $0x270] sm:$0xff]  }
  0x81   :  { %v75_v44 = vpop.permute.xlu0 %74  ;;  %v2039_v45 = vpop.permute.xlu1 %390 }
  0x82   :  { %vm76_vm0 = vcmp.eq.s32.totalorder %v2034_v42, %v75_v44  ;;  %vm77_vm1 = vcmp.eq.s32.totalorder %v2037_v43, %v75_v44  ;;  %vm393_vm2 = vcmp.eq.s32.totalorder %v2037_v43, %v2039_v45  ;;  %vm392_vm12 = vcmp.eq.s32.totalorder %v2034_v42, %v2039_v45  ;;  %v1832_v44 = vld [vmem:[%s2334_s1 + $0x230] sm:$0xff]   ;;  %v1834_v45 = vld [vmem:[%s2334_s1 + $0x2a8] sm:$0xff]  }
  0x83   :  { %vm1344_vm3 = vmpackc.low %vm76_vm0, %vm76_vm0 }
  0x84   :  { %vm1342_vm4 = vmpackc.low %vm77_vm1, %vm77_vm1 }
  0x85   :  { %1343 = vmatprep.mubr.msk.bf16.mxu0 %vm1342_vm4, %v1895_v48  ;;  %vm1416_vm5 = vmpackc.low %vm393_vm2, %vm393_vm2 }
  0x86   :  { %1345 = vmatmul.mubr.msk.bf16.vlgmr.msra.gmra.mrb[0].mxu0 %vm1344_vm3, %v1895_v48  ;;  %v32_v49 = vpop.permute.xlu0 %31  ;;  %v2053_v50 = vpop.permute.xlu1 %571  ;;  %vm1418_vm14 = vmpackc.low %vm392_vm12, %vm392_vm12 }
  0x87   :  { %1644 = vmatpush3.bf16.msra.mxu0 %v1777_v46  ;;  %vm33_vm6 = vcmp.eq.s32.totalorder %v2034_v42, %v32_v49  ;;  %vm34_vm7 = vcmp.eq.s32.totalorder %v2037_v43, %v32_v49  ;;  %1417 = vmatprep.mubr.msk.bf16.mxu0 %vm1416_vm5, %v1895_v48  ;;  %vm574_vm9 = vcmp.eq.s32.totalorder %v2037_v43, %v2053_v50  ;;  %v1835_v46 = vld [vmem:[%s2334_s1 + $0x278] sm:$0xff]  }
  0x88   :  { %vm1364_vm8 = vmpackc.low %vm33_vm6, %vm33_vm6  ;;  %1645 = vmatprep.subr.bf16.mxu0 %v1779_v47  ;;  %vm573_vm0 = vcmp.eq.s32.totalorder %v2034_v42, %v2053_v50  ;;  %v1837_v47 = vld [vmem:[%s2334_s1 + $0x2f0] sm:$0xff]   ;;  %v1836_v49 = vld [vmem:[%s2334_s1 + $0x238] sm:$0xff]  }
  0x89   :  { %vm1362_vm10 = vmpackc.low %vm34_vm7, %vm34_vm7  ;;  %v1838_v50 = vld [vmem:[%s2334_s1 + $0x2b0] sm:$0xff]  }
  0x8a   :  { %1363 = vmatprep.mubr.msk.bf16.mxu1 %vm1362_vm10, %v1895_v48  ;;  %vm1470_vm11 = vmpackc.low %vm574_vm9, %vm574_vm9 }
  0x8b   :  { %1646 = vmatpush3.bf16.msra.mxu0 %v1780_v51  ;;  %1365 = vmatmul.mubr.msk.bf16.vlgmr.msra.gmra.mrb[0].mxu1 %vm1364_vm8, %v1895_v48  ;;  %v2135_v12 = vpop.permute.xlu1 %752  ;;  %v2162_v20 = vpop.permute.xlu0 %933  ;;  %vm1472_vm2 = vmpackc.low %vm573_vm0, %vm573_vm0  ;;  %v1839_v51 = vld [vmem:[%s2334_s1 + $0x2f8] sm:$0xff]  }
  0x8c   :  { %1666 = vmatpush3.bf16.msra.mxu1 %v1782_v52  ;;  %1647 = vmatprep.subr.bf16.mxu0 %v1783_v53  ;;  %vm755_vm13 = vcmp.eq.s32.totalorder %v2037_v43, %v2135_v12  ;;  %vm936_vm1 = vcmp.eq.s32.totalorder %v2037_v43, %v2162_v20  ;;  %v1833_v43 = vld [vmem:[%s2334_s1 + $0x2e8] sm:$0xff]   ;;  %vm754_vm4 = vcmp.eq.s32.totalorder %v2034_v42, %v2135_v12  ;;  %v1840_v52 = vld [vmem:[%s2334_s1 + $0x2b8] sm:$0xff]  }
  0x8d   :  { %1667 = vmatprep.subr.bf16.mxu1 %v1785_v54  ;;  %1471 = vmatprep.mubr.msk.bf16.mxu1 %vm1470_vm11, %v1895_v48  ;;  %vm1524_vm15 = vmpackc.low %vm755_vm13, %vm755_vm13  ;;  %vm935_vm6 = vcmp.eq.s32.totalorder %v2034_v42, %v2162_v20  ;;  %v1841_v53 = vld [vmem:[%s2336_s3] ss:$8 sps:$4 sm:$0xff]   ;;  %v1843_v54 = vld [vmem:[%s2336_s3 + $0x4] ss:$8 sps:$4 sm:$0xff]  }
  0x8e   :  { %vm1578_vm3 = vmpackc.low %vm936_vm1, %vm936_vm1  ;;  %v1846_v42 = vld [vmem:[%s2336_s3 + $0x14] ss:$8 sps:$4 sm:$0xff]  }
  0x8f   :  { %1648 = vmatpush3.bf16.msra.mxu0 %v1784_v55  ;;  %vm1526_vm5 = vmpackc.low %vm754_vm4, %vm754_vm4  ;;  %v1847_v55 = vld [vmem:[%s2336_s3 + $0x20] ss:$8 sps:$4 sm:$0xff]  }
  0x90   :  { %1668 = vmatpush3.bf16.msra.mxu1 %v1786_v56  ;;  %1649 = vmatprep.subr.bf16.mxu0 %v1787_v57  ;;  %vm1580_vm7 = vmpackc.low %vm935_vm6, %vm935_vm6  ;;  %v1852_v56 = vld [vmem:[%s2336_s3 + $0x34] ss:$8 sps:$4 sm:$0xff]   ;;  %v1850_v57 = vld [vmem:[%s2336_s3 + $0x30] ss:$8 sps:$4 sm:$0xff]  }
  0x91   :  { %1669 = vmatprep.subr.bf16.mxu1 %v1789_v58  ;;  %v1855_v58 = vld [vmem:[%s2336_s3 + $0x44] ss:$8 sps:$4 sm:$0xff]  }
  0x93   :  { %1650 = vmatpush3.bf16.msra.mxu0 %v1788_v59  ;;  %v1853_v59 = vld [vmem:[%s2336_s3 + $0x40] ss:$8 sps:$4 sm:$0xff]  }
  0x94   :  { %1670 = vmatpush3.bf16.msra.mxu1 %v1790_v60  ;;  %1651 = vmatprep.subr.bf16.mxu0 %v1791_v61  ;;  %v1858_v60 = vld [vmem:[%s2336_s3 + $0x54] ss:$8 sps:$4 sm:$0xff]   ;;  %v1856_v61 = vld [vmem:[%s2336_s3 + $0x50] ss:$8 sps:$4 sm:$0xff]  }
  0x95   :  { %1671 = vmatprep.subr.bf16.mxu1 %v1793_v62  ;;  %v1861_v62 = vld [vmem:[%s2336_s3 + $0x64] ss:$8 sps:$4 sm:$0xff]  }
  0x97   :  { %1652 = vmatpush3.bf16.msra.mxu0 %v1792_v63  ;;  %v1859_v63 = vld [vmem:[%s2336_s3 + $0x60] ss:$8 sps:$4 sm:$0xff]  }
  0x98   :  { %1672 = vmatpush3.bf16.msra.mxu1 %v1794_v0  ;;  %1653 = vmatprep.subr.bf16.mxu0 %v1795_v1  ;;  %v1864_v0 = vld [vmem:[%s2336_s3 + $0x74] ss:$8 sps:$4 sm:$0xff]   ;;  %v1862_v1 = vld [vmem:[%s2336_s3 + $0x70] ss:$8 sps:$4 sm:$0xff]  }
  0x99   :  { %1673 = vmatprep.subr.bf16.mxu1 %v1797_v2 }
  0x9b   :  { %1654 = vmatpush3.bf16.msra.mxu0 %v1796_v3 }
  0x9c   :  { %1674 = vmatpush3.bf16.msra.mxu1 %v1798_v4  ;;  %1655 = vmatprep.subr.bf16.mxu0 %v1799_v5 }
  0x9d   :  { %1675 = vmatprep.subr.bf16.mxu1 %v1801_v6 }
  0x9f   :  { %1656 = vmatpush3.bf16.msra.mxu0 %v1800_v7 }
  0xa0   :  { %1676 = vmatpush3.bf16.msra.mxu1 %v1802_v9  ;;  %1657 = vmatprep.subr.bf16.mxu0 %v1803_v10 }
  0xa1   :  { %1677 = vmatprep.subr.bf16.mxu1 %v1805_v11 }
  0xa3   :  { %1658 = vmatpush3.bf16.msra.mxu0 %v1804_v13 }
  0xa4   :  { %1678 = vmatpush3.bf16.msra.mxu1 %v1806_v14  ;;  %1687 = vmatprep.subr.bf16.mxu0 %v1807_v15 }
  0xa5   :  { %1679 = vmatprep.subr.bf16.mxu1 %v1808_v16 }
  0xa6   :  { %1419 = vmatmul.mubr.msk.bf16.vlgmr.msra.gmra.mrb[4].mxu0 %vm1418_vm14, %v1895_v48 }
  0xa7   :  { %1688 = vmatpush3.bf16.msra.mxu0 %v1809_v17  ;;  %1525 = vmatprep.mubr.msk.bf16.mxu0 %vm1524_vm15, %v1895_v48 }
  0xa8   :  { %1680 = vmatpush3.bf16.msra.mxu1 %v1810_v18  ;;  %1689 = vmatprep.subr.bf16.mxu0 %v1811_v19 }
  0xa9   :  { %1709 = vmatprep.subr.bf16.mxu1 %v1813_v21 }
  0xab   :  { %1473 = vmatmul.mubr.msk.bf16.vlgmr.msra.gmra.mrb[4].mxu1 %vm1472_vm2, %v1895_v48  ;;  %1690 = vmatpush3.bf16.msra.mxu0 %v1812_v22 }
  0xac   :  { %1710 = vmatpush3.bf16.msra.mxu1 %v1814_v23  ;;  %1691 = vmatprep.subr.bf16.mxu0 %v1815_v24 }
  0xad   :  { %1711 = vmatprep.subr.bf16.mxu1 %v1817_v25  ;;  %1579 = vmatprep.mubr.msk.bf16.mxu1 %vm1578_vm3, %v1895_v48 }
  0xaf   :  { %1692 = vmatpush3.bf16.msra.mxu0 %v1816_v26 }
  0xb0   :  { %1712 = vmatpush3.bf16.msra.mxu1 %v1818_v27  ;;  %1693 = vmatprep.subr.bf16.mxu0 %v1819_v28 }
  0xb1   :  { %1713 = vmatprep.subr.bf16.mxu1 %v1821_v29 }
  0xb3   :  { %1694 = vmatpush3.bf16.msra.mxu0 %v1820_v30 }
  0xb4   :  { %1714 = vmatpush3.bf16.msra.mxu1 %v1822_v31  ;;  %1695 = vmatprep.subr.bf16.mxu0 %v1823_v32 }
  0xb5   :  { %1715 = vmatprep.subr.bf16.mxu1 %v1825_v33 }
  0xb7   :  { %1696 = vmatpush3.bf16.msra.mxu0 %v1824_v34 }
  0xb8   :  { %1716 = vmatpush3.bf16.msra.mxu1 %v1826_v35  ;;  %1697 = vmatprep.subr.bf16.mxu0 %v1827_v36  ;;  %v1582_v36 = vld [vmem:[%s2335_s2] ss:$0 sm:$0xff]  ;;  %s1282_s2 = sshll.u32 %s1896_s11, 4  ;;  %s1283_s2 = int_to_ptr.vmem [resolvable:$true] %s1282_s2 }
  0xb9   :  { %1717 = vmatprep.subr.bf16.mxu1 %v1829_v37  ;;  %s1865_s12 = scalar_lea.vmem %s1283_s2, 256  ;;  %p1870_p1 = scmp.lt.s32.totalorder %s1283_s2, %s1283_s2 }
  0xba   :  { %p1866_p0 = scmp.ne.s32.totalorder %s1283_s2, %s1865_s12  ;;  %p1871_p2 = scmp.lt.s32.totalorder %s1865_s12, %s1865_s12 }
  0xbb   :  { %1698 = vmatpush3.bf16.msra.mxu0 %v1828_v38 }
  0xbc   :  { %1718 = vmatpush3.bf16.msra.mxu1 %v1830_v39  ;;  %1699 = vmatprep.subr.bf16.mxu0 %v1831_v40  ;;  %p1872_p3 = por %p1871_p2, %p1870_p1 }
  0xbd   :  { %1719 = vmatprep.subr.bf16.mxu1 %v1833_v43 }
  0xbe   :  { %p1873_p4 = pnand %p1872_p3, %p1866_p0 }
  0xbf   :  { %1700 = vmatpush3.bf16.msra.mxu0 %v1832_v44 }
  0xc0   :  { %1720 = vmatpush3.bf16.msra.mxu1 %v1834_v45  ;;  %1701 = vmatprep.subr.bf16.mxu0 %v1835_v46  ;;  %v1144_v45 = vshrl.u32 %v26_v41, 7 }
  0xc1   :  { %1721 = vmatprep.subr.bf16.mxu1 %v1837_v47  ;;  %v1141_v47 = vld [vmem:[%s2337_s4] sm:$0x3] }
  0xc2   :  { %v1145_v46 = vsub.s32 0, %v1144_v45 }
  0xc3   :  { %1702 = vmatpush3.bf16.msra.mxu0 %v1836_v49  ;;  %v1149_v49 = vsub.s32 1, %v1144_v45 }
  0xc4   :  { %1722 = vmatpush3.bf16.msra.mxu1 %v1838_v50  ;;  %1233 = vmatprep.subr.bf16.mxu0 %v1843_v54  ;;  %v1146_v50 = vrot.slane %v1141_v47, %v1145_v46 }
  0xc5   :  { %1723 = vmatprep.subr.bf16.mxu1 %v1839_v51  ;;  %v1150_v51 = vrot.slane %v1141_v47, %v1149_v49 }
  0xc6   :  { %1527 = vmatmul.mubr.msk.bf16.vlgmr.msra.gmra.mrb[8].mxu0 %vm1526_vm5, %v1895_v48 }
  0xc7   :  { %1265 = vmatprep.mubr.bf16.mxu0 %v1891_v8  ;;  %1234 = vmatpush1.bf16.msra.mxu0 %v1841_v53  ;;  %v1844_v8 = vld [vmem:[%s2336_s3 + $0x10] ss:$8 sps:$4 sm:$0xff]  }
  0xc8   :  { %1724 = vmatpush3.bf16.msra.mxu1 %v1840_v52  ;;  %1235 = vmatprep.subr.bf16.mxu0 %v1846_v42 }
  0xcb   :  { %1581 = vmatmul.mubr.msk.bf16.vlgmr.msra.gmra.mrb[8].mxu1 %vm1580_vm7, %v1895_v48  ;;  %1236 = vmatpush1.bf16.msra.mxu0 %v1844_v8  ;;  %v1849_v48 = vld [vmem:[%s2336_s3 + $0x24] ss:$8 sps:$4 sm:$0xff]  }
  0xcc   :  { %1237 = vmatprep.subr.bf16.mxu0 %v1849_v48 }
  0xcf   :  { %1238 = vmatpush1.bf16.msra.mxu0 %v1847_v55 }
  0xd0   :  { %1239 = vmatprep.subr.bf16.mxu0 %v1852_v56 }
  0xd3   :  { %1240 = vmatpush1.bf16.msra.mxu0 %v1850_v57 }
  0xd4   :  { %1241 = vmatprep.subr.bf16.mxu0 %v1855_v58 }
  0xd7   :  { %1242 = vmatpush1.bf16.msra.mxu0 %v1853_v59 }
  0xd8   :  { %1243 = vmatprep.subr.bf16.mxu0 %v1858_v60 }
  0xdb   :  { %1244 = vmatpush1.bf16.msra.mxu0 %v1856_v61 }
  0xdc   :  { %1245 = vmatprep.subr.bf16.mxu0 %v1861_v62 }
  0xdf   :  { %1246 = vmatpush1.bf16.msra.mxu0 %v1859_v63 }
  0xe0   :  { %1247 = vmatprep.subr.bf16.mxu0 %v1864_v0 }
  0xe3   :  { %1248 = vmatpush1.bf16.msra.mxu0 %v1862_v1 }
 0x159   :  { %v1615_v2 = vpop.f32.mrb[0].mxu0 }
 0x15a   :  { %v1616_v3 = vpop.f32.mrb[1].mxu0 }
 0x15b   :  { %v1617_v4 = vadd.f32 %v1616_v3, %v1615_v2  ;;  %v1618_v5 = vpop.f32.mrb[2].mxu0 }
 0x15c   :  { %v1619_v6 = vpop.f32.mrb[3].mxu0 }
 0x15e   :  { %v1637_v7 = vpop.f32.mrb[0].mxu1 }
 0x15f   :  { %v1638_v9 = vpop.f32.mrb[1].mxu1 }
 0x160   :  { %v1639_v10 = vadd.f32 %v1638_v9, %v1637_v7  ;;  %v1640_v11 = vpop.f32.mrb[2].mxu1 }
 0x161   :  { %v1641_v12 = vpop.f32.mrb[3].mxu1 }
 0x162   :  { %v384_v13 = vadd.f32 %v1639_v10, %v1617_v4 }
 0x179   :  { %v1659_v14 = vpop.f32.mrb[4].mxu0 }
 0x17a   :  { %v1660_v15 = vpop.f32.mrb[5].mxu0 }
 0x17b   :  { %v1661_v16 = vadd.f32 %v1660_v15, %v1659_v14  ;;  %v1662_v17 = vpop.f32.mrb[6].mxu0 }
 0x17c   :  { %v1663_v18 = vpop.f32.mrb[7].mxu0 }
 0x17d   :  { %v569_v19 = vadd.f32 %v1661_v16, %v384_v13 }
 0x17e   :  { %v1681_v20 = vpop.f32.mrb[4].mxu1 }
 0x17f   :  { %v1682_v21 = vpop.f32.mrb[5].mxu1 }
 0x180   :  { %v1683_v22 = vadd.f32 %v1682_v21, %v1681_v20  ;;  %v1684_v23 = vpop.f32.mrb[6].mxu1 }
 0x181   :  { %v1685_v24 = vpop.f32.mrb[7].mxu1 }
 0x182   :  { %v750_v25 = vadd.f32 %v1683_v22, %v569_v19 }
 0x199   :  { %v1703_v26 = vpop.f32.mrb[8].mxu0 }
 0x19a   :  { %v1704_v27 = vpop.f32.mrb[9].mxu0 }
 0x19b   :  { %v1705_v28 = vadd.f32 %v1704_v27, %v1703_v26  ;;  %v1706_v29 = vpop.f32.mrb[10].mxu0 }
 0x19c   :  { %v1707_v30 = vpop.f32.mrb[11].mxu0 }
 0x19d   :  { %v931_v31 = vadd.f32 %v1705_v28, %v750_v25 }
 0x19e   :  { %v1725_v32 = vpop.f32.mrb[8].mxu1 }
 0x19f   :  { %v1726_v33 = vpop.f32.mrb[9].mxu1 }
 0x1a0   :  { %v1727_v34 = vadd.f32 %v1726_v33, %v1725_v32  ;;  %v1728_v35 = vpop.f32.mrb[10].mxu1 }
 0x1a1   :  { %v1729_v37 = vpop.f32.mrb[11].mxu1 }
 0x1a2   :  { %v1112_v38 = vadd.f32 %v1727_v34, %v931_v31 }
 0x1a4   :  { %v1120_v39 = vadd.f32 %v1582_v36, %v1112_v38 }
 0x1a6   :  { %v1121_v40 = vmax.f32 %v1120_v39, 0.0 }
 0x1a8   :  { %v1122_v43 = vpack.c.bf16 %v1121_v40, %v1121_v40 }
 0x1aa   :  { %1123 = vst [vmem:[#allocation2] sm:$0xf] %v1122_v43 }
 0x1b1   :  { %v1124_v44 = vld [vmem:[#allocation2] sm:$0xf] }
 0x1b2   :  { %1266 = vmatmul.mubr.bf16.vlgmr.msra.gmra.mrb[12].mxu0 %v1124_v44 }
 0x285   :  { %v1267_v52 = vpop.f32.mrb[12].mxu0 }
 0x286   :  { %v1268_v53 = vadd.f32 %v1267_v52, %v1146_v50  ;;  %v1269_v54 = vpop.f32.mrb[13].mxu0 }
 0x287   :  { %v1270_v42 = vadd.f32 %v1269_v54, %v1150_v51  ;;  %v1271_v8 = vpop.f32.mrb[14].mxu0 }
 0x288   :  { %1274 = vst [vmem:[#allocation3] sm:$0xff] %v1268_v53  ;;  %v1272_v48 = vpop.f32.mrb[15].mxu0 }
 0x289   :  { %1275 = vst [vmem:[#allocation3 + $0x8] sm:$0xff] %v1270_v42 }
 0x28a   :  { %1876 = shalt.err (!%p1873_p4)
}
 0x28b   :  { %s1877_s14 = scalar_lea.hbm %s2338_s5, 256 }
 0x28c   :  { %p1878_p5 = scmp.ne.s32.totalorder %s2338_s5, %s1877_s14  ;;  %p1881_p6 = scmp.lt.u32.totalorder %s1877_s14, %s2338_s5 }
 0x28e   :  { %p1883_p7 = pnand %p1881_p6, %p1878_p5 }
 0x290   :  { %1886 = shalt.err (!%p1883_p7)
}
 0x291   :  { %1285 = dma.vmem_to_hbm [thread:$0]  %s1283_s2, 256, %s2338_s5, [#allocation4]  }
 0x292   :  { %1887 = dma.done.wait [#allocation4], 256  }
 0x293   :  { %1888 = vsyncadd [#allocation4], 4294967040 }
 0x294   :  { %1289 = vsyncpa [#allocation4], 1 }

</bundles_post_ra>
